<compile_context>
chip_gen: v7x
topology: tpu7x:2x2x1
jax: 0.10.0
libtpu: 0.0.40
codegen_flags: <defaults>
</compile_context>

<pallas_src>
import functools
import math

import jax
import jax.numpy as jnp
from jax.experimental import pallas as pl
from jax.experimental.pallas import tpu as pltpu


_PALLAS_MIN_BYTES = 256 * 1024  # below this, skip the kernel launch entirely


def _pe_add_kernel(x_ref, pe_ref, o_ref, *, batch):
    # x_ref / o_ref: (block_rows, batch * d_model); pe_ref: (block_rows, d_model).
    pe = pe_ref[...]
    if batch > 1:
        # Replicate the PE row across the batch along the lane axis so it lines
        # up with the flattened (batch * d_model) layout of x.  Pure lane-concat
        # work, which has ample slack in an HBM-bandwidth-bound kernel.
        pe = jnp.concatenate([pe] * batch, axis=-1)
    o_ref[...] = x_ref[...] + pe


def make_pe(max_len, d_model, dtype=jnp.float32):
    """Sinusoidal positional-encoding table, shape (max_len, d_model)."""
    if d_model % 2 != 0:
        # (The reference torch module also breaks for odd d_model.)
        raise ValueError(f"d_model must be even, got {d_model}")
    position = jnp.arange(max_len, dtype=jnp.float32)[:, None]
    div_term = jnp.exp(jnp.arange(0, d_model, 2, dtype=jnp.float32)
                       * (-math.log(10000.0) / d_model))
    ang = position * div_term
    pe = jnp.zeros((max_len, d_model), jnp.float32)
    pe = pe.at[:, 0::2].set(jnp.sin(ang))
    pe = pe.at[:, 1::2].set(jnp.cos(ang))
    return pe.astype(dtype)


def _plan_blocks(S, B, E, itemsize, block_rows=None):
    """Byte-budgeted tile rows + (optional) raised scoped-VMEM limit."""
    try:
        vmem_cap = int(pltpu.get_tpu_info().vmem_capacity_bytes)
    except Exception:
        vmem_cap = 64 * 1024 * 1024  # v7x has the smallest per-core VMEM
    # VMEM bytes per tile row: x-in + out + pe, each double-buffered by Pallas.
    per_row = 2 * (2 * B * E + E) * itemsize
    if block_rows is None:
        budget_rows = max(1, (vmem_cap // 3) // per_row)          # stay well under physical VMEM
        min_rows = pl.cdiv(512 * 1024, B * E * itemsize)          # >= ~512 KiB of x per step
        pipeline_rows = pl.cdiv(S, 8)                             # aim ~8 steps for big inputs
        block_rows = max(min(budget_rows, pipeline_rows), min_rows)
    block_rows = max(1, min(block_rows, S))
    if block_rows < S:
        # Partial blocks must be sublane-aligned: 8 (f32) / 16 (bf16) / 32 (int8).
        sublane = max(8, 32 // max(1, itemsize))
        block_rows = min(max(sublane, (block_rows // sublane) * sublane), S)
    block_bytes = per_row * block_rows
    vmem_limit = None
    if block_bytes > 12 * 1024 * 1024:  # would not fit v5e's 16 MiB default scoped VMEM
        vmem_limit = min(block_bytes + block_bytes // 2 + (2 << 20), vmem_cap * 3 // 4)
    return block_rows, vmem_limit


def positional_encoding_forward(x, pe, *, block_rows=None, use_pallas=None, in_place=False):
    """x: (S, B, E); pe: (max_len, E).  Returns x + pe[:S, None, :] (eval-mode dropout)."""
    S, B, E = x.shape
    max_len, pe_e = pe.shape
    if pe_e != E:
        raise ValueError(f"d_model mismatch: x has {E}, pe has {pe_e}")
    if S > max_len:
        raise ValueError(f"sequence length {S} exceeds positional table max_len {max_len}")

    pe_slice = pe[:S]
    if pe_slice.dtype != x.dtype:
        pe_slice = pe_slice.astype(x.dtype)  # prefer building pe in x.dtype via make_pe(dtype=...)

    itemsize = jnp.dtype(x.dtype).itemsize
    if use_pallas is None:
        use_pallas = (S * B * E * itemsize) >= _PALLAS_MIN_BYTES
    if not use_pallas:
        # Tiny input: one fused XLA add beats a standalone kernel launch.
        return x + pe_slice[:, None, :]

    block_rows, vmem_limit = _plan_blocks(S, B, E, itemsize, block_rows)
    grid = (pl.cdiv(S, block_rows),)

    # Free row-major view: element (s, b, e) lives at lane b*E + e of row s.
    x2 = x.reshape(S, B * E)

    out2 = pl.pallas_call(
        functools.partial(_pe_add_kernel, batch=B),
        out_shape=jax.ShapeDtypeStruct((S, B * E), x.dtype),
        grid=grid,
        in_specs=[pl.BlockSpec((block_rows, B * E), lambda i: (i, 0)),
                  pl.BlockSpec((block_rows, E), lambda i: (i, 0))],
        out_specs=pl.BlockSpec((block_rows, B * E), lambda i: (i, 0)),
        input_output_aliases=({0: 0} if in_place else {}),
        compiler_params=pltpu.CompilerParams(
            dimension_semantics=("parallel",),   # lets v7x's 2 TCs split the seq axis
            vmem_limit_bytes=vmem_limit),
    )(x2, pe_slice)
    return out2.reshape(S, B, E)


if __name__ == "__main__":
    d_model = 32
    max_len = 2000
    S, B = 8, 2            # (seq, batch, d_model): PyTorch batch_first=False layout

    key = jax.random.PRNGKey(0)
    x = jax.random.normal(key, (S, B, d_model), jnp.float32)
    pe = make_pe(max_len, d_model, dtype=x.dtype)

    # Reference (dropout is identity at inference).
    ref = x + pe[:S][:, None, :]

    # Force the Pallas path (the auto dispatch would take the fused-XLA
    # fallback for an input this small).
    fwd = jax.jit(functools.partial(positional_encoding_forward, use_pallas=True))
    out = jax.block_until_ready(fwd(x, pe))
    assert out.shape == (S, B, d_model), out.shape
    assert float(jnp.max(jnp.abs(out - ref))) < 1e-6, "pallas path mismatch"

    # Aliased (in-place capable) variant — identical numerics.
    fwd_ip = jax.jit(functools.partial(positional_encoding_forward,
                                       use_pallas=True, in_place=True))
    out_ip = jax.block_until_ready(fwd_ip(x, pe))
    assert float(jnp.max(jnp.abs(out_ip - ref))) < 1e-6, "in-place path mismatch"

    # Auto dispatch: tiny input takes the fused-XLA path (no kernel launch).
    out_auto = jax.block_until_ready(jax.jit(positional_encoding_forward)(x, pe))
    assert float(jnp.max(jnp.abs(out_auto - ref))) < 1e-6, "fallback path mismatch"

    print("KERNEL_OK")
</pallas_src>

<mosaic_0001>
module attributes {stable_mosaic.version = 11 : i64} {
  func.func @_pe_add_kernel(%arg0: i32, %arg1: memref<8x64xf32, #tpu.memory_space<vmem>>, %arg2: memref<8x32xf32, #tpu.memory_space<vmem>>, %arg3: memref<8x64xf32, #tpu.memory_space<vmem>>) attributes {dimension_semantics = [#tpu.dimension_semantics<parallel>], iteration_bounds = array<i64: 1>, scalar_prefetch = 0 : i64, scratch_operands = 0 : i64, tpu.core_type = #tpu.core_type<tc>, window_params = [{transform_indices = @transform_0, window_bounds = array<i64: 8, 64>}, {transform_indices = @transform_1, window_bounds = array<i64: 8, 32>}, {transform_indices = @transform_2, window_bounds = array<i64: 8, 64>}]} {
    %c0 = arith.constant 0 : index
    %c0_0 = arith.constant 0 : index
    %0 = vector.load %arg2[%c0, %c0_0] : memref<8x32xf32, #tpu.memory_space<vmem>>, vector<8x32xf32>
    %1 = tpu.concatenate %0, %0 in 1 : vector<8x32xf32>, vector<8x32xf32> -> vector<8x64xf32>
    %c0_1 = arith.constant 0 : index
    %c0_2 = arith.constant 0 : index
    %2 = vector.load %arg1[%c0_1, %c0_2] : memref<8x64xf32, #tpu.memory_space<vmem>>, vector<8x64xf32>
    %3 = arith.addf %2, %1 : vector<8x64xf32>
    %c0_3 = arith.constant 0 : index
    %c0_4 = arith.constant 0 : index
    %4 = vector.load %arg3[%c0_3, %c0_4] : memref<8x64xf32, #tpu.memory_space<vmem>>, vector<8x64xf32>
    tpu.vector_store %arg3[%c0_3, %c0_4], %3 {strides = array<i32>} : memref<8x64xf32, #tpu.memory_space<vmem>>, vector<8x64xf32>,
    return
  }
  func.func @transform_0(%arg0: i32) -> (i32, i32) {
    %c0_i32 = arith.constant 0 : i32
    %c0_i32_0 = arith.constant 0 : i32
    return %arg0, %c0_i32 : i32, i32
  }
  func.func @transform_1(%arg0: i32) -> (i32, i32) {
    %c0_i32 = arith.constant 0 : i32
    %c0_i32_0 = arith.constant 0 : i32
    return %arg0, %c0_i32 : i32, i32
  }
  func.func @transform_2(%arg0: i32) -> (i32, i32) {
    %c0_i32 = arith.constant 0 : i32
    %c0_i32_0 = arith.constant 0 : i32
    return %arg0, %c0_i32 : i32, i32
  }
}

</mosaic_0001>

<bundles_post_ra>
// kernel: positional_encoding_forward.1
= control target key start
LH: loop header
LB: loop body
LE: loop exit
PB: predicated region body
PF: predicated region fallthrough
CT: control target
= control target key end

     0   :  { %s27_s11 = smov 32   ;;  %vm16_vm0 = vcmask 261120   ;;  %vm20_vm1 = vcmask 523264   ;;  %s52_s1 = inlined_call_operand.vmem [shape: f32[8,32], index: 1, kind: input, shape index: {}]   ;;  %s53_s0 = inlined_call_operand.vmem [shape: f32[8,64], index: 0, kind: input, shape index: {}]   ;;  %s54_s2 = inlined_call_operand.vmem [shape: f32[8,64], index: 2, kind: output, shape index: {}]  }
   0x1   :  { %v11_v0 = vld [vmem:[%s52_s1] sm:$0xff] }
   0x2   :  { %13 = vrot.lane.b32.xlu0 %v11_v0, %s27_s11  ;;  %v18_v1 = vld [vmem:[%s53_s0] sm:$0xff] }
  0x74   :  { %v14_v2 = vpop.permute.xlu0 %13 }
  0x75   :  { %v17_v3 = vsel %vm16_vm0, %v11_v0, %v14_v2 }
  0x76   :  { %v19_v4 = vadd.f32 %v18_v1, %v17_v3 }
  0x78   :  { %21 = vst.msk [vmem:[%s54_s2] sm:$0xff] %vm20_vm1, %v19_v4 }

</bundles_post_ra>
